<compile_context>
chip_gen: v7x
topology: tpu7x:2x2x1
jax: 0.10.0
libtpu: 0.0.40
codegen_flags: <defaults>
</compile_context>

<pallas_src>
import functools

import jax
import jax.numpy as jnp
import numpy as np
from jax.experimental import pallas as pl
from jax.experimental.pallas import tpu as pltpu

LANE = 128  # TPU lane width; all reduced / matmul dims are padded to this


def _round_up(x, m):
    return (x + m - 1) // m * m


def _cdiv(a, b):
    return (a + b - 1) // b


# ----------------------------- Pallas kernel --------------------------------
def bioxnet_kernel(x_ref, wdiag_ref,
                   dec1w_ref, dec1b_ref,
                   k0_ref, dec2w_ref, dec2b_ref,
                   k1_ref, dec3w_ref, dec3b_ref,
                   ow1_ref, ob1_ref, ow2_ref, ob2_ref,
                   out_ref, *, n_genes_pad, k_per_gene):
    f32 = jnp.float32
    bf16 = jnp.bfloat16
    Gp = n_genes_pad

    # --- layer1: Diagonal ----------------------------------------------------
    # x is pre-permuted feature-type-major and zero-padded so feature type j of
    # every gene occupies the lane-aligned slab [j*Gp, (j+1)*Gp) (Gp % 128 == 0
    # -> static aligned slices, no relayout).  x streams bf16, math is f32 VPU.
    partials = []
    for j in range(k_per_gene):
        lo = j * Gp                                    # static, multiple of 128
        partials.append(x_ref[:, lo:lo + Gp].astype(f32)
                        * wdiag_ref[:, lo:lo + Gp])
    # independent partial sums -> short tree reduce (fills VALU slots for k > 2)
    while len(partials) > 1:
        partials = [partials[i] + partials[i + 1] if i + 1 < len(partials)
                    else partials[i] for i in range(0, len(partials), 2)]
    h = jnp.tanh(partials[0])                          # (TB, Gp) f32, pads = 0

    # decision_layer1_single_output (Linear(G,1)): lane-wise reduce (pads are 0)
    out_ref[:, 1:2] = (jnp.sum(h * dec1w_ref[...], axis=-1, keepdims=True)
                       + dec1b_ref[0, 0])

    # --- HiddenLayer0: SparseTF (mask pre-folded, bf16 MXU, f32 accum), tanh --
    h = jnp.tanh(jnp.dot(h.astype(bf16), k0_ref[...],
                         preferred_element_type=f32))  # (TB, P1p)
    out_ref[:, 2:3] = (jnp.sum(h * dec2w_ref[...], axis=-1, keepdims=True)
                       + dec2b_ref[0, 0])

    # --- HiddenLayer1: SparseTF, tanh -----------------------------------------
    h = jnp.tanh(jnp.dot(h.astype(bf16), k1_ref[...],
                         preferred_element_type=f32))  # (TB, P2p)
    out_ref[:, 3:4] = (jnp.sum(h * dec3w_ref[...], axis=-1, keepdims=True)
                       + dec3b_ref[0, 0])

    # --- output head: Linear(P2,P2) -> LeakyReLU(0.01) -> Linear(P2,1) --------
    t = jnp.dot(h.astype(bf16), ow1_ref[...],
                preferred_element_type=f32) + ob1_ref[...]
    t = jnp.where(t > 0, t, 0.01 * t)
    out_ref[:, 0:1] = (jnp.sum(t * ow2_ref[...], axis=-1, keepdims=True)
                       + ob2_ref[0, 0])


# ---------------------- host-side parameter folding --------------------------
def prepare_kernel_params(p, n_genes):
    """One-time folding/padding of the PyTorch-style params into kernel layout.

    All pads are exact zeros: padded genes/pathways produce tanh(0)=0
    activations and contribute 0 to every reduction and matmul.
    """
    f32, bf16 = jnp.float32, jnp.bfloat16
    G = n_genes
    F = p["diag_kernel"].shape[1]
    k = F // G
    P1 = p["k0"].shape[1]
    P2 = p["k1"].shape[1]
    Gp, P1p, P2p = (_round_up(d, LANE) for d in (G, P1, P2))

    def pad2(a, rows, cols):
        return jnp.pad(a, ((0, rows - a.shape[0]), (0, cols - a.shape[1])))

    # Diagonal kernel: feature-type-major, each type's slab zero-padded to Gp
    wdiag = pad2(p["diag_kernel"].reshape(G, k).T, k, Gp).reshape(1, k * Gp)

    return dict(
        wdiag=wdiag.astype(f32),
        dec1_w=pad2(p["dec1_w"].T, 1, Gp).astype(f32),
        dec1_b=p["dec1_b"].astype(f32),                       # (1,1) -> SMEM
        k0=pad2(p["map0"] * p["k0"], Gp, P1p).astype(bf16),   # mask folded
        dec2_w=pad2(p["dec2_w"].T, 1, P1p).astype(f32),
        dec2_b=p["dec2_b"].astype(f32),
        k1=pad2(p["map1"] * p["k1"], P1p, P2p).astype(bf16),
        dec3_w=pad2(p["dec3_w"].T, 1, P2p).astype(f32),
        dec3_b=p["dec3_b"].astype(f32),
        ow1=pad2(p["ow1"], P2p, P2p).astype(bf16),
        ob1=pad2(p["ob1"], 1, P2p).astype(f32),
        ow2=pad2(p["ow2"].T, 1, P2p).astype(f32),
        ob2=p["ob2"].astype(f32),
        n_genes=G, n_genes_pad=Gp, k_per_gene=k,
    )


# ------------------------------- wrapper --------------------------------------
def bioxnet_forward(x, kp, *, batch_tile=512):
    f32, bf16 = jnp.float32, jnp.bfloat16
    G, Gp, k = kp["n_genes"], kp["n_genes_pad"], kp["k_per_gene"]
    B, F = x.shape
    assert F == G * k
    F_pad = k * Gp
    P1p = kp["k0"].shape[1]
    P2p = kp["k1"].shape[1]

    weights = (kp["wdiag"], kp["dec1_w"], kp["dec1_b"],
               kp["k0"], kp["dec2_w"], kp["dec2_b"],
               kp["k1"], kp["dec3_w"], kp["dec3_b"],
               kp["ow1"], kp["ob1"], kp["ow2"], kp["ob2"])
    smem_idx = {2, 5, 8, 12}                           # (1,1) scalar biases
    vmem_weight_bytes = sum(int(w.size) * w.dtype.itemsize
                            for i, w in enumerate(weights) if i not in smem_idx)

    # Generation-aware VMEM budget: ~80% of physical VMEM (leave headroom for
    # Mosaic internal scratch / semaphores). v7x -> ~51 MiB, v5e/v6e -> ~102 MiB.
    try:
        vmem_cap = int(pltpu.get_tpu_info().vmem_capacity_bytes)
    except Exception:
        vmem_cap = 64 * 1024 * 1024
    usable = (vmem_cap * 4) // 5
    vmem_limit = int(min(max(usable, 16 * 1024 * 1024), vmem_cap))

    # Batch tile: multiple of 8 sublanes; prefer >=2 grid steps when the batch
    # allows it (megacore sharding on v7x); shrink if VMEM footprint too big.
    b8 = _round_up(B, 8)
    tb = min(_round_up(batch_tile, 8), b8)
    if b8 >= 16 and _cdiv(b8, tb) < 2:
        tb = _round_up(_cdiv(b8, 2), 8)

    def footprint(t):
        x_bufs = 3 * t * F_pad * 2                     # bf16 x, up to 3 buffers
        out_bufs = 2 * t * 4 * 4
        acts = 4 * t * max(Gp, P1p, P2p) * 4           # live f32 intermediates
        return vmem_weight_bytes + x_bufs + out_bufs + acts

    while tb > 8 and footprint(tb) > usable:
        tb = max(8, _round_up(tb // 2, 8))
    B_pad = _round_up(B, tb)
    grid = (B_pad // tb,)

    kernel = functools.partial(bioxnet_kernel, n_genes_pad=Gp, k_per_gene=k)
    out_spec = pl.BlockSpec((tb, 4), lambda i: (i, 0))
    smem_spec = pl.BlockSpec(memory_space=pltpu.MemorySpace.SMEM)

    def make_in_specs(use_pipeline_mode):
        def resident(a):
            nd = a.ndim
            kwargs = {}
            if use_pipeline_mode:
                # constant index_map: nothing to overlap, single buffer halves
                # the resident-weight VMEM footprint.
                kwargs["pipeline_mode"] = pl.Buffered(1)
            return pl.BlockSpec(a.shape, lambda i: (0,) * nd, **kwargs)

        x_kwargs = {}
        if use_pipeline_mode and grid[0] >= 3:
            # only streaming input; a 3rd buffer hides exposed x DMA.
            x_kwargs["pipeline_mode"] = pl.Buffered(3)
        specs = [pl.BlockSpec((tb, F_pad), lambda i: (i, 0), **x_kwargs)]
        for i, w in enumerate(weights):
            specs.append(smem_spec if i in smem_idx else resident(w))
        return specs

    def run(in_specs):
        @jax.jit
        def _run(xin, *ws):
            # fused permute (gene-major -> type-major) + pad + bf16 cast of x
            xp = xin.reshape(B, G, k).transpose(0, 2, 1)
            xp = jnp.pad(xp, ((0, B_pad - B), (0, 0), (0, Gp - G)))
            xp = xp.reshape(B_pad, F_pad).astype(bf16)
            fused = pl.pallas_call(
                kernel,
                grid=grid,
                in_specs=in_specs,
                out_specs=out_spec,
                out_shape=jax.ShapeDtypeStruct((B_pad, 4), f32),
                compiler_params=pltpu.CompilerParams(
                    dimension_semantics=("parallel",),
                    vmem_limit_bytes=vmem_limit),
            )(xp, *ws)
            return fused[:B, 0:1], fused[:B, 1:4]

        res = _run(x, *weights)
        jax.block_until_ready(res)
        return res

    try:
        outcome, decisions = run(make_in_specs(use_pipeline_mode=True))
    except Exception:
        # pipeline_mode not supported on this jax/libtpu combo -> fall back to
        # the default (double-buffered) specs, which are known-good.
        outcome, decisions = run(make_in_specs(use_pipeline_mode=False))

    # module returns (outcome, attention_probs_list); attention=False -> Nones
    attention_probs_list = [None, None, None]
    return outcome, decisions, attention_probs_list


# ------------------------- deterministic parameters ---------------------------
def xavier_uniform(key, shape, fan_in, fan_out):
    bound = float(np.sqrt(6.0 / (fan_in + fan_out)))
    return jax.random.uniform(key, shape, jnp.float32, -bound, bound)


def make_params(key, n_features, n_genes, n_p1, n_p2):
    keys = jax.random.split(key, 15)

    # Diagonal layer1 kernel (1, n_features), no bias (use_bias=False)
    diag_kernel = xavier_uniform(keys[0], (1, n_features), n_features, 1)

    # decision layers (nn.Linear(in, 1), bias=True) stored as (in, 1)
    dec1_w = xavier_uniform(keys[1], (n_genes, 1), n_genes, 1)
    dec1_b = jax.random.uniform(keys[2], (1, 1), jnp.float32, -0.1, 0.1)
    dec2_w = xavier_uniform(keys[3], (n_p1, 1), n_p1, 1)
    dec2_b = jax.random.uniform(keys[4], (1, 1), jnp.float32, -0.1, 0.1)
    dec3_w = xavier_uniform(keys[5], (n_p2, 1), n_p2, 1)
    dec3_b = jax.random.uniform(keys[6], (1, 1), jnp.float32, -0.1, 0.1)

    # synthetic reactome binary maps (gene -> pathway connectivity)
    map0 = jax.random.bernoulli(keys[7], 0.3, (n_genes, n_p1)).astype(jnp.float32)
    map1 = jax.random.bernoulli(keys[8], 0.3, (n_p1, n_p2)).astype(jnp.float32)
    # SparseTF kernels (use_bias=False)
    k0 = xavier_uniform(keys[9], (n_genes, n_p1), n_genes, n_p1)
    k1 = xavier_uniform(keys[10], (n_p1, n_p2), n_p1, n_p2)

    # output head: Linear(n_p2, n_p2) -> LeakyReLU -> Linear(n_p2, 1)
    ow1 = xavier_uniform(keys[11], (n_p2, n_p2), n_p2, n_p2)
    ob1 = jax.random.uniform(keys[12], (1, n_p2), jnp.float32, -0.1, 0.1)
    ow2 = xavier_uniform(keys[13], (n_p2, 1), n_p2, 1)
    ob2 = jax.random.uniform(keys[14], (1, 1), jnp.float32, -0.1, 0.1)

    return dict(diag_kernel=diag_kernel,
                dec1_w=dec1_w, dec1_b=dec1_b,
                map0=map0, k0=k0, dec2_w=dec2_w, dec2_b=dec2_b,
                map1=map1, k1=k1, dec3_w=dec3_w, dec3_b=dec3_b,
                ow1=ow1, ob1=ob1, ow2=ow2, ob2=ob2)


# --------------------------- pure-JAX reference -------------------------------
def reference_forward(x, p):
    """Mirrors the module's math with the kernel's bf16-stream mixed precision."""
    f32, bf16 = jnp.float32, jnp.bfloat16
    B, F = x.shape
    G = p["dec1_w"].shape[0]
    k = F // G
    xq = x.astype(bf16).astype(f32)                   # kernel streams x in bf16
    # Diagonal layer (x * kernel, grouped sum of k consecutive features), tanh
    mult = xq * p["diag_kernel"]
    h = jnp.tanh(mult.reshape(B, G, k).sum(axis=2))
    d1 = h @ p["dec1_w"] + p["dec1_b"]
    k0m = (p["map0"] * p["k0"]).astype(bf16)
    h = jnp.tanh(jnp.dot(h.astype(bf16), k0m, preferred_element_type=f32))
    d2 = h @ p["dec2_w"] + p["dec2_b"]
    k1m = (p["map1"] * p["k1"]).astype(bf16)
    h = jnp.tanh(jnp.dot(h.astype(bf16), k1m, preferred_element_type=f32))
    d3 = h @ p["dec3_w"] + p["dec3_b"]
    t = jnp.dot(h.astype(bf16), p["ow1"].astype(bf16),
                preferred_element_type=f32) + p["ob1"]
    t = jnp.where(t > 0, t, 0.01 * t)
    out = t @ p["ow2"] + p["ob2"]
    return out, jnp.concatenate([d1, d2, d3], axis=1)


if __name__ == "__main__":
    B, N_FEATURES, N_GENES, N_P1, N_P2 = 8, 64, 32, 32, 16

    key = jax.random.PRNGKey(0)
    kx, kp_key = jax.random.split(key)
    x = jax.random.normal(kx, (B, N_FEATURES), jnp.float32)
    params = make_params(kp_key, N_FEATURES, N_GENES, N_P1, N_P2)

    kernel_params = prepare_kernel_params(params, N_GENES)
    outcome, decisions, attn = bioxnet_forward(x, kernel_params)
    outcome = jax.block_until_ready(outcome)
    decisions = jax.block_until_ready(decisions)

    ref_out, ref_dec = reference_forward(x, params)
    assert outcome.shape == (B, 1)
    assert decisions.shape == (B, 3)
    assert attn == [None, None, None]
    assert jnp.allclose(outcome, ref_out, atol=1e-4, rtol=1e-3)
    assert jnp.allclose(decisions, ref_dec, atol=1e-4, rtol=1e-3)

    print("KERNEL_OK")
</pallas_src>

<mosaic_0001>
module attributes {stable_mosaic.version = 11 : i64} {
  func.func @bioxnet_kernel(%arg0: i32, %arg1: memref<8x256xbf16, #tpu.memory_space<vmem>>, %arg2: memref<1x256xf32, #tpu.memory_space<vmem>>, %arg3: memref<1x128xf32, #tpu.memory_space<vmem>>, %arg4: memref<1x1xf32, #tpu.memory_space<smem>>, %arg5: memref<128x128xbf16, #tpu.memory_space<vmem>>, %arg6: memref<1x128xf32, #tpu.memory_space<vmem>>, %arg7: memref<1x1xf32, #tpu.memory_space<smem>>, %arg8: memref<128x128xbf16, #tpu.memory_space<vmem>>, %arg9: memref<1x128xf32, #tpu.memory_space<vmem>>, %arg10: memref<1x1xf32, #tpu.memory_space<smem>>, %arg11: memref<128x128xbf16, #tpu.memory_space<vmem>>, %arg12: memref<1x128xf32, #tpu.memory_space<vmem>>, %arg13: memref<1x128xf32, #tpu.memory_space<vmem>>, %arg14: memref<1x1xf32, #tpu.memory_space<smem>>, %arg15: memref<8x4xf32, #tpu.memory_space<vmem>>) attributes {dimension_semantics = [#tpu.dimension_semantics<parallel>], iteration_bounds = array<i64: 1>, scalar_prefetch = 0 : i64, scratch_operands = 0 : i64, tpu.core_type = #tpu.core_type<tc>, window_params = [{transform_indices = @transform_0, window_bounds = array<i64: 8, 256>}, {pipeline_mode = #tpu.pipeline_mode<synchronous>, transform_indices = @transform_1, window_bounds = array<i64: 1, 256>}, {pipeline_mode = #tpu.pipeline_mode<synchronous>, transform_indices = @transform_2, window_bounds = array<i64: 1, 128>}, {transform_indices = @transform_3, window_bounds = array<i64: 1, 1>}, {pipeline_mode = #tpu.pipeline_mode<synchronous>, transform_indices = @transform_4, window_bounds = array<i64: 128, 128>}, {pipeline_mode = #tpu.pipeline_mode<synchronous>, transform_indices = @transform_5, window_bounds = array<i64: 1, 128>}, {transform_indices = @transform_6, window_bounds = array<i64: 1, 1>}, {pipeline_mode = #tpu.pipeline_mode<synchronous>, transform_indices = @transform_7, window_bounds = array<i64: 128, 128>}, {pipeline_mode = #tpu.pipeline_mode<synchronous>, transform_indices = @transform_8, window_bounds = array<i64: 1, 128>}, {transform_indices = @transform_9, window_bounds = array<i64: 1, 1>}, {pipeline_mode = #tpu.pipeline_mode<synchronous>, transform_indices = @transform_10, window_bounds = array<i64: 128, 128>}, {pipeline_mode = #tpu.pipeline_mode<synchronous>, transform_indices = @transform_11, window_bounds = array<i64: 1, 128>}, {pipeline_mode = #tpu.pipeline_mode<synchronous>, transform_indices = @transform_12, window_bounds = array<i64: 1, 128>}, {transform_indices = @transform_13, window_bounds = array<i64: 1, 1>}, {transform_indices = @transform_14, window_bounds = array<i64: 8, 4>}]} {
    %c0 = arith.constant 0 : index
    %c0_0 = arith.constant 0 : index
    %0 = vector.load %arg1[%c0, %c0_0] : memref<8x256xbf16, #tpu.memory_space<vmem>>, vector<8x128xbf16>
    %1 = arith.extf %0 : vector<8x128xbf16> to vector<8x128xf32>
    %c0_1 = arith.constant 0 : index
    %c0_2 = arith.constant 0 : index
    %2 = vector.load %arg2[%c0_1, %c0_2] : memref<1x256xf32, #tpu.memory_space<vmem>>, vector<1x128xf32>
    %3 = vector.broadcast %2 : vector<1x128xf32> to vector<8x128xf32>
    %4 = arith.mulf %1, %3 : vector<8x128xf32>
    %c0_3 = arith.constant 0 : index
    %c128 = arith.constant 128 : index
    %5 = vector.load %arg1[%c0_3, %c128] : memref<8x256xbf16, #tpu.memory_space<vmem>>, vector<8x128xbf16>
    %6 = arith.extf %5 : vector<8x128xbf16> to vector<8x128xf32>
    %c0_4 = arith.constant 0 : index
    %c128_5 = arith.constant 128 : index
    %7 = vector.load %arg2[%c0_4, %c128_5] : memref<1x256xf32, #tpu.memory_space<vmem>>, vector<1x128xf32>
    %8 = vector.broadcast %7 : vector<1x128xf32> to vector<8x128xf32>
    %9 = arith.mulf %6, %8 : vector<8x128xf32>
    %10 = arith.addf %4, %9 : vector<8x128xf32>
    %11 = math.tanh %10 : vector<8x128xf32>
    %c0_6 = arith.constant 0 : index
    %c0_7 = arith.constant 0 : index
    %12 = vector.load %arg3[%c0_6, %c0_7] : memref<1x128xf32, #tpu.memory_space<vmem>>, vector<1x128xf32>
    %13 = vector.broadcast %12 : vector<1x128xf32> to vector<8x128xf32>
    %14 = arith.mulf %11, %13 : vector<8x128xf32>
    %cst = arith.constant dense<0.000000e+00> : vector<8xf32>
    %15 = vector.multi_reduction <add>, %14, %cst [1] : vector<8x128xf32> to vector<8xf32>
    %16 = vector.shape_cast %15 : vector<8xf32> to vector<8x1xf32>
    %c0_8 = arith.constant 0 : index
    %c0_9 = arith.constant 0 : index
    %17 = memref.load %arg4[%c0_8, %c0_9] : memref<1x1xf32, #tpu.memory_space<smem>>
    %18 = vector.broadcast %17 : f32 to vector<8x1xf32>
    %19 = arith.addf %16, %18 : vector<8x1xf32>
    %c0_10 = arith.constant 0 : index
    %c1 = arith.constant 1 : index
    %20 = vector.load %arg15[%c0_10, %c1] : memref<8x4xf32, #tpu.memory_space<vmem>>, vector<8x1xf32>
    tpu.vector_store %arg15[%c0_10, %c1], %19 {strides = array<i32>} : memref<8x4xf32, #tpu.memory_space<vmem>>, vector<8x1xf32>,
    %21 = arith.truncf %11 : vector<8x128xf32> to vector<8x128xbf16>
    %c0_11 = arith.constant 0 : index
    %c0_12 = arith.constant 0 : index
    %22 = vector.load %arg5[%c0_11, %c0_12] : memref<128x128xbf16, #tpu.memory_space<vmem>>, vector<128x128xbf16>
    %cst_13 = arith.constant dense<0.000000e+00> : vector<8x128xf32>
    %23 = tpu.matmul %21, %22, %cst_13 {dimension_numbers = #tpu.dot_dimension_numbers<[1], [0], [0], [1], [0, 0, 1, 1], [], []>} : vector<8x128xbf16>, vector<128x128xbf16>, vector<8x128xf32> -> vector<8x128xf32>
    %24 = math.tanh %23 : vector<8x128xf32>
    %c0_14 = arith.constant 0 : index
    %c0_15 = arith.constant 0 : index
    %25 = vector.load %arg6[%c0_14, %c0_15] : memref<1x128xf32, #tpu.memory_space<vmem>>, vector<1x128xf32>
    %26 = vector.broadcast %25 : vector<1x128xf32> to vector<8x128xf32>
    %27 = arith.mulf %24, %26 : vector<8x128xf32>
    %cst_16 = arith.constant dense<0.000000e+00> : vector<8xf32>
    %28 = vector.multi_reduction <add>, %27, %cst_16 [1] : vector<8x128xf32> to vector<8xf32>
    %29 = vector.shape_cast %28 : vector<8xf32> to vector<8x1xf32>
    %c0_17 = arith.constant 0 : index
    %c0_18 = arith.constant 0 : index
    %30 = memref.load %arg7[%c0_17, %c0_18] : memref<1x1xf32, #tpu.memory_space<smem>>
    %31 = vector.broadcast %30 : f32 to vector<8x1xf32>
    %32 = arith.addf %29, %31 : vector<8x1xf32>
    %c0_19 = arith.constant 0 : index
    %c2 = arith.constant 2 : index
    %33 = vector.load %arg15[%c0_19, %c2] : memref<8x4xf32, #tpu.memory_space<vmem>>, vector<8x1xf32>
    tpu.vector_store %arg15[%c0_19, %c2], %32 {strides = array<i32>} : memref<8x4xf32, #tpu.memory_space<vmem>>, vector<8x1xf32>,
    %34 = arith.truncf %24 : vector<8x128xf32> to vector<8x128xbf16>
    %c0_20 = arith.constant 0 : index
    %c0_21 = arith.constant 0 : index
    %35 = vector.load %arg8[%c0_20, %c0_21] : memref<128x128xbf16, #tpu.memory_space<vmem>>, vector<128x128xbf16>
    %cst_22 = arith.constant dense<0.000000e+00> : vector<8x128xf32>
    %36 = tpu.matmul %34, %35, %cst_22 {dimension_numbers = #tpu.dot_dimension_numbers<[1], [0], [0], [1], [0, 0, 1, 1], [], []>} : vector<8x128xbf16>, vector<128x128xbf16>, vector<8x128xf32> -> vector<8x128xf32>
    %37 = math.tanh %36 : vector<8x128xf32>
    %c0_23 = arith.constant 0 : index
    %c0_24 = arith.constant 0 : index
    %38 = vector.load %arg9[%c0_23, %c0_24] : memref<1x128xf32, #tpu.memory_space<vmem>>, vector<1x128xf32>
    %39 = vector.broadcast %38 : vector<1x128xf32> to vector<8x128xf32>
    %40 = arith.mulf %37, %39 : vector<8x128xf32>
    %cst_25 = arith.constant dense<0.000000e+00> : vector<8xf32>
    %41 = vector.multi_reduction <add>, %40, %cst_25 [1] : vector<8x128xf32> to vector<8xf32>
    %42 = vector.shape_cast %41 : vector<8xf32> to vector<8x1xf32>
    %c0_26 = arith.constant 0 : index
    %c0_27 = arith.constant 0 : index
    %43 = memref.load %arg10[%c0_26, %c0_27] : memref<1x1xf32, #tpu.memory_space<smem>>
    %44 = vector.broadcast %43 : f32 to vector<8x1xf32>
    %45 = arith.addf %42, %44 : vector<8x1xf32>
    %c0_28 = arith.constant 0 : index
    %c3 = arith.constant 3 : index
    %46 = vector.load %arg15[%c0_28, %c3] : memref<8x4xf32, #tpu.memory_space<vmem>>, vector<8x1xf32>
    tpu.vector_store %arg15[%c0_28, %c3], %45 {strides = array<i32>} : memref<8x4xf32, #tpu.memory_space<vmem>>, vector<8x1xf32>,
    %47 = arith.truncf %37 : vector<8x128xf32> to vector<8x128xbf16>
    %c0_29 = arith.constant 0 : index
    %c0_30 = arith.constant 0 : index
    %48 = vector.load %arg11[%c0_29, %c0_30] : memref<128x128xbf16, #tpu.memory_space<vmem>>, vector<128x128xbf16>
    %cst_31 = arith.constant dense<0.000000e+00> : vector<8x128xf32>
    %49 = tpu.matmul %47, %48, %cst_31 {dimension_numbers = #tpu.dot_dimension_numbers<[1], [0], [0], [1], [0, 0, 1, 1], [], []>} : vector<8x128xbf16>, vector<128x128xbf16>, vector<8x128xf32> -> vector<8x128xf32>
    %c0_32 = arith.constant 0 : index
    %c0_33 = arith.constant 0 : index
    %50 = vector.load %arg12[%c0_32, %c0_33] : memref<1x128xf32, #tpu.memory_space<vmem>>, vector<1x128xf32>
    %51 = vector.broadcast %50 : vector<1x128xf32> to vector<8x128xf32>
    %52 = arith.addf %49, %51 : vector<8x128xf32>
    %cst_34 = arith.constant 0.000000e+00 : f32
    %53 = vector.broadcast %cst_34 : f32 to vector<8x128xf32>
    %54 = arith.cmpf ogt, %52, %53 : vector<8x128xf32>
    %cst_35 = arith.constant 0.00999999977 : f32
    %55 = vector.broadcast %cst_35 : f32 to vector<8x128xf32>
    %56 = arith.mulf %55, %52 : vector<8x128xf32>
    %57 = arith.select %54, %52, %56 : vector<8x128xi1>, vector<8x128xf32>
    %c0_36 = arith.constant 0 : index
    %c0_37 = arith.constant 0 : index
    %58 = vector.load %arg13[%c0_36, %c0_37] : memref<1x128xf32, #tpu.memory_space<vmem>>, vector<1x128xf32>
    %59 = vector.broadcast %58 : vector<1x128xf32> to vector<8x128xf32>
    %60 = arith.mulf %57, %59 : vector<8x128xf32>
    %cst_38 = arith.constant dense<0.000000e+00> : vector<8xf32>
    %61 = vector.multi_reduction <add>, %60, %cst_38 [1] : vector<8x128xf32> to vector<8xf32>
    %62 = vector.shape_cast %61 : vector<8xf32> to vector<8x1xf32>
    %c0_39 = arith.constant 0 : index
    %c0_40 = arith.constant 0 : index
    %63 = memref.load %arg14[%c0_39, %c0_40] : memref<1x1xf32, #tpu.memory_space<smem>>
    %64 = vector.broadcast %63 : f32 to vector<8x1xf32>
    %65 = arith.addf %62, %64 : vector<8x1xf32>
    %c0_41 = arith.constant 0 : index
    %c0_42 = arith.constant 0 : index
    %66 = vector.load %arg15[%c0_41, %c0_42] : memref<8x4xf32, #tpu.memory_space<vmem>>, vector<8x1xf32>
    tpu.vector_store %arg15[%c0_41, %c0_42], %65 {strides = array<i32>} : memref<8x4xf32, #tpu.memory_space<vmem>>, vector<8x1xf32>,
    return
  }
  func.func @transform_0(%arg0: i32) -> (i32, i32) {
    %c0_i32 = arith.constant 0 : i32
    %c0_i32_0 = arith.constant 0 : i32
    return %arg0, %c0_i32 : i32, i32
  }
  func.func @transform_1(%arg0: i32) -> (i32, i32) {
    %c0_i32 = arith.constant 0 : i32
    %c0_i32_0 = arith.constant 0 : i32
    %c0_i32_1 = arith.constant 0 : i32
    return %c0_i32, %c0_i32_0 : i32, i32
  }
  func.func @transform_2(%arg0: i32) -> (i32, i32) {
    %c0_i32 = arith.constant 0 : i32
    %c0_i32_0 = arith.constant 0 : i32
    %c0_i32_1 = arith.constant 0 : i32
    return %c0_i32, %c0_i32_0 : i32, i32
  }
  func.func @transform_3(%arg0: i32) -> (i32, i32) {
    %c0_i32 = arith.constant 0 : i32
    %c0_i32_0 = arith.constant 0 : i32
    %c0_i32_1 = arith.constant 0 : i32
    return %c0_i32, %c0_i32_0 : i32, i32
  }
  func.func @transform_4(%arg0: i32) -> (i32, i32) {
    %c0_i32 = arith.constant 0 : i32
    %c0_i32_0 = arith.constant 0 : i32
    %c0_i32_1 = arith.constant 0 : i32
    return %c0_i32, %c0_i32_0 : i32, i32
  }
  func.func @transform_5(%arg0: i32) -> (i32, i32) {
    %c0_i32 = arith.constant 0 : i32
    %c0_i32_0 = arith.constant 0 : i32
    %c0_i32_1 = arith.constant 0 : i32
    return %c0_i32, %c0_i32_0 : i32, i32
  }
  func.func @transform_6(%arg0: i32) -> (i32, i32) {
    %c0_i32 = arith.constant 0 : i32
    %c0_i32_0 = arith.constant 0 : i32
    %c0_i32_1 = arith.constant 0 : i32
    return %c0_i32, %c0_i32_0 : i32, i32
  }
  func.func @transform_7(%arg0: i32) -> (i32, i32) {
    %c0_i32 = arith.constant 0 : i32
    %c0_i32_0 = arith.constant 0 : i32
    %c0_i32_1 = arith.constant 0 : i32
    return %c0_i32, %c0_i32_0 : i32, i32
  }
  func.func @transform_8(%arg0: i32) -> (i32, i32) {
    %c0_i32 = arith.constant 0 : i32
    %c0_i32_0 = arith.constant 0 : i32
    %c0_i32_1 = arith.constant 0 : i32
    return %c0_i32, %c0_i32_0 : i32, i32
  }
  func.func @transform_9(%arg0: i32) -> (i32, i32) {
    %c0_i32 = arith.constant 0 : i32
    %c0_i32_0 = arith.constant 0 : i32
    %c0_i32_1 = arith.constant 0 : i32
    return %c0_i32, %c0_i32_0 : i32, i32
  }
  func.func @transform_10(%arg0: i32) -> (i32, i32) {
    %c0_i32 = arith.constant 0 : i32
    %c0_i32_0 = arith.constant 0 : i32
    %c0_i32_1 = arith.constant 0 : i32
    return %c0_i32, %c0_i32_0 : i32, i32
  }
  func.func @transform_11(%arg0: i32) -> (i32, i32) {
    %c0_i32 = arith.constant 0 : i32
    %c0_i32_0 = arith.constant 0 : i32
    %c0_i32_1 = arith.constant 0 : i32
    return %c0_i32, %c0_i32_0 : i32, i32
  }
  func.func @transform_12(%arg0: i32) -> (i32, i32) {
    %c0_i32 = arith.constant 0 : i32
    %c0_i32_0 = arith.constant 0 : i32
    %c0_i32_1 = arith.constant 0 : i32
    return %c0_i32, %c0_i32_0 : i32, i32
  }
  func.func @transform_13(%arg0: i32) -> (i32, i32) {
    %c0_i32 = arith.constant 0 : i32
    %c0_i32_0 = arith.constant 0 : i32
    %c0_i32_1 = arith.constant 0 : i32
    return %c0_i32, %c0_i32_0 : i32, i32
  }
  func.func @transform_14(%arg0: i32) -> (i32, i32) {
    %c0_i32 = arith.constant 0 : i32
    %c0_i32_0 = arith.constant 0 : i32
    return %arg0, %c0_i32 : i32, i32
  }
}

module attributes {stable_mosaic.version = 11 : i64} {
  func.func @bioxnet_kernel(%arg0: i32, %arg1: memref<8x256xbf16, #tpu.memory_space<vmem>>, %arg2: memref<1x256xf32, #tpu.memory_space<vmem>>, %arg3: memref<1x128xf32, #tpu.memory_space<vmem>>, %arg4: memref<1x1xf32, #tpu.memory_space<smem>>, %arg5: memref<128x128xbf16, #tpu.memory_space<vmem>>, %arg6: memref<1x128xf32, #tpu.memory_space<vmem>>, %arg7: memref<1x1xf32, #tpu.memory_space<smem>>, %arg8: memref<128x128xbf16, #tpu.memory_space<vmem>>, %arg9: memref<1x128xf32, #tpu.memory_space<vmem>>, %arg10: memref<1x1xf32, #tpu.memory_space<smem>>, %arg11: memref<128x128xbf16, #tpu.memory_space<vmem>>, %arg12: memref<1x128xf32, #tpu.memory_space<vmem>>, %arg13: memref<1x128xf32, #tpu.memory_space<vmem>>, %arg14: memref<1x1xf32, #tpu.memory_space<smem>>, %arg15: memref<8x4xf32, #tpu.memory_space<vmem>>) attributes {dimension_semantics = [#tpu.dimension_semantics<parallel>], iteration_bounds = array<i64: 1>, scalar_prefetch = 0 : i64, scratch_operands = 0 : i64, tpu.core_type = #tpu.core_type<tc>, window_params = [{transform_indices = @transform_0, window_bounds = array<i64: 8, 256>}, {pipeline_mode = #tpu.pipeline_mode<synchronous>, transform_indices = @transform_1, window_bounds = array<i64: 1, 256>}, {pipeline_mode = #tpu.pipeline_mode<synchronous>, transform_indices = @transform_2, window_bounds = array<i64: 1, 128>}, {transform_indices = @transform_3, window_bounds = array<i64: 1, 1>}, {pipeline_mode = #tpu.pipeline_mode<synchronous>, transform_indices = @transform_4, window_bounds = array<i64: 128, 128>}, {pipeline_mode = #tpu.pipeline_mode<synchronous>, transform_indices = @transform_5, window_bounds = array<i64: 1, 128>}, {transform_indices = @transform_6, window_bounds = array<i64: 1, 1>}, {pipeline_mode = #tpu.pipeline_mode<synchronous>, transform_indices = @transform_7, window_bounds = array<i64: 128, 128>}, {pipeline_mode = #tpu.pipeline_mode<synchronous>, transform_indices = @transform_8, window_bounds = array<i64: 1, 128>}, {transform_indices = @transform_9, window_bounds = array<i64: 1, 1>}, {pipeline_mode = #tpu.pipeline_mode<synchronous>, transform_indices = @transform_10, window_bounds = array<i64: 128, 128>}, {pipeline_mode = #tpu.pipeline_mode<synchronous>, transform_indices = @transform_11, window_bounds = array<i64: 1, 128>}, {pipeline_mode = #tpu.pipeline_mode<synchronous>, transform_indices = @transform_12, window_bounds = array<i64: 1, 128>}, {transform_indices = @transform_13, window_bounds = array<i64: 1, 1>}, {transform_indices = @transform_14, window_bounds = array<i64: 8, 4>}]} {
    %c0 = arith.constant 0 : index
    %c0_0 = arith.constant 0 : index
    %0 = vector.load %arg1[%c0, %c0_0] : memref<8x256xbf16, #tpu.memory_space<vmem>>, vector<8x128xbf16>
    %1 = arith.extf %0 : vector<8x128xbf16> to vector<8x128xf32>
    %c0_1 = arith.constant 0 : index
    %c0_2 = arith.constant 0 : index
    %2 = vector.load %arg2[%c0_1, %c0_2] : memref<1x256xf32, #tpu.memory_space<vmem>>, vector<1x128xf32>
    %3 = vector.broadcast %2 : vector<1x128xf32> to vector<8x128xf32>
    %4 = arith.mulf %1, %3 : vector<8x128xf32>
    %c0_3 = arith.constant 0 : index
    %c128 = arith.constant 128 : index
    %5 = vector.load %arg1[%c0_3, %c128] : memref<8x256xbf16, #tpu.memory_space<vmem>>, vector<8x128xbf16>
    %6 = arith.extf %5 : vector<8x128xbf16> to vector<8x128xf32>
    %c0_4 = arith.constant 0 : index
    %c128_5 = arith.constant 128 : index
    %7 = vector.load %arg2[%c0_4, %c128_5] : memref<1x256xf32, #tpu.memory_space<vmem>>, vector<1x128xf32>
    %8 = vector.broadcast %7 : vector<1x128xf32> to vector<8x128xf32>
    %9 = arith.mulf %6, %8 : vector<8x128xf32>
    %10 = arith.addf %4, %9 : vector<8x128xf32>
    %11 = math.tanh %10 : vector<8x128xf32>
    %c0_6 = arith.constant 0 : index
    %c0_7 = arith.constant 0 : index
    %12 = vector.load %arg3[%c0_6, %c0_7] : memref<1x128xf32, #tpu.memory_space<vmem>>, vector<1x128xf32>
    %13 = vector.broadcast %12 : vector<1x128xf32> to vector<8x128xf32>
    %14 = arith.mulf %11, %13 : vector<8x128xf32>
    %cst = arith.constant dense<0.000000e+00> : vector<8xf32>
    %15 = vector.multi_reduction <add>, %14, %cst [1] : vector<8x128xf32> to vector<8xf32>
    %16 = vector.shape_cast %15 : vector<8xf32> to vector<8x1xf32>
    %c0_8 = arith.constant 0 : index
    %c0_9 = arith.constant 0 : index
    %17 = memref.load %arg4[%c0_8, %c0_9] : memref<1x1xf32, #tpu.memory_space<smem>>
    %18 = vector.broadcast %17 : f32 to vector<8x1xf32>
    %19 = arith.addf %16, %18 : vector<8x1xf32>
    %c0_10 = arith.constant 0 : index
    %c1 = arith.constant 1 : index
    %20 = vector.load %arg15[%c0_10, %c1] : memref<8x4xf32, #tpu.memory_space<vmem>>, vector<8x1xf32>
    tpu.vector_store %arg15[%c0_10, %c1], %19 {strides = array<i32>} : memref<8x4xf32, #tpu.memory_space<vmem>>, vector<8x1xf32>,
    %21 = arith.truncf %11 : vector<8x128xf32> to vector<8x128xbf16>
    %c0_11 = arith.constant 0 : index
    %c0_12 = arith.constant 0 : index
    %22 = vector.load %arg5[%c0_11, %c0_12] : memref<128x128xbf16, #tpu.memory_space<vmem>>, vector<128x128xbf16>
    %cst_13 = arith.constant dense<0.000000e+00> : vector<8x128xf32>
    %23 = tpu.matmul %21, %22, %cst_13 {dimension_numbers = #tpu.dot_dimension_numbers<[1], [0], [0], [1], [0, 0, 1, 1], [], []>} : vector<8x128xbf16>, vector<128x128xbf16>, vector<8x128xf32> -> vector<8x128xf32>
    %24 = math.tanh %23 : vector<8x128xf32>
    %c0_14 = arith.constant 0 : index
    %c0_15 = arith.constant 0 : index
    %25 = vector.load %arg6[%c0_14, %c0_15] : memref<1x128xf32, #tpu.memory_space<vmem>>, vector<1x128xf32>
    %26 = vector.broadcast %25 : vector<1x128xf32> to vector<8x128xf32>
    %27 = arith.mulf %24, %26 : vector<8x128xf32>
    %cst_16 = arith.constant dense<0.000000e+00> : vector<8xf32>
    %28 = vector.multi_reduction <add>, %27, %cst_16 [1] : vector<8x128xf32> to vector<8xf32>
    %29 = vector.shape_cast %28 : vector<8xf32> to vector<8x1xf32>
    %c0_17 = arith.constant 0 : index
    %c0_18 = arith.constant 0 : index
    %30 = memref.load %arg7[%c0_17, %c0_18] : memref<1x1xf32, #tpu.memory_space<smem>>
    %31 = vector.broadcast %30 : f32 to vector<8x1xf32>
    %32 = arith.addf %29, %31 : vector<8x1xf32>
    %c0_19 = arith.constant 0 : index
    %c2 = arith.constant 2 : index
    %33 = vector.load %arg15[%c0_19, %c2] : memref<8x4xf32, #tpu.memory_space<vmem>>, vector<8x1xf32>
    tpu.vector_store %arg15[%c0_19, %c2], %32 {strides = array<i32>} : memref<8x4xf32, #tpu.memory_space<vmem>>, vector<8x1xf32>,
    %34 = arith.truncf %24 : vector<8x128xf32> to vector<8x128xbf16>
    %c0_20 = arith.constant 0 : index
    %c0_21 = arith.constant 0 : index
    %35 = vector.load %arg8[%c0_20, %c0_21] : memref<128x128xbf16, #tpu.memory_space<vmem>>, vector<128x128xbf16>
    %cst_22 = arith.constant dense<0.000000e+00> : vector<8x128xf32>
    %36 = tpu.matmul %34, %35, %cst_22 {dimension_numbers = #tpu.dot_dimension_numbers<[1], [0], [0], [1], [0, 0, 1, 1], [], []>} : vector<8x128xbf16>, vector<128x128xbf16>, vector<8x128xf32> -> vector<8x128xf32>
    %37 = math.tanh %36 : vector<8x128xf32>
    %c0_23 = arith.constant 0 : index
    %c0_24 = arith.constant 0 : index
    %38 = vector.load %arg9[%c0_23, %c0_24] : memref<1x128xf32, #tpu.memory_space<vmem>>, vector<1x128xf32>
    %39 = vector.broadcast %38 : vector<1x128xf32> to vector<8x128xf32>
    %40 = arith.mulf %37, %39 : vector<8x128xf32>
    %cst_25 = arith.constant dense<0.000000e+00> : vector<8xf32>
    %41 = vector.multi_reduction <add>, %40, %cst_25 [1] : vector<8x128xf32> to vector<8xf32>
    %42 = vector.shape_cast %41 : vector<8xf32> to vector<8x1xf32>
    %c0_26 = arith.constant 0 : index
    %c0_27 = arith.constant 0 : index
    %43 = memref.load %arg10[%c0_26, %c0_27] : memref<1x1xf32, #tpu.memory_space<smem>>
    %44 = vector.broadcast %43 : f32 to vector<8x1xf32>
    %45 = arith.addf %42, %44 : vector<8x1xf32>
    %c0_28 = arith.constant 0 : index
    %c3 = arith.constant 3 : index
    %46 = vector.load %arg15[%c0_28, %c3] : memref<8x4xf32, #tpu.memory_space<vmem>>, vector<8x1xf32>
    tpu.vector_store %arg15[%c0_28, %c3], %45 {strides = array<i32>} : memref<8x4xf32, #tpu.memory_space<vmem>>, vector<8x1xf32>,
    %47 = arith.truncf %37 : vector<8x128xf32> to vector<8x128xbf16>
    %c0_29 = arith.constant 0 : index
    %c0_30 = arith.constant 0 : index
    %48 = vector.load %arg11[%c0_29, %c0_30] : memref<128x128xbf16, #tpu.memory_space<vmem>>, vector<128x128xbf16>
    %cst_31 = arith.constant dense<0.000000e+00> : vector<8x128xf32>
    %49 = tpu.matmul %47, %48, %cst_31 {dimension_numbers = #tpu.dot_dimension_numbers<[1], [0], [0], [1], [0, 0, 1, 1], [], []>} : vector<8x128xbf16>, vector<128x128xbf16>, vector<8x128xf32> -> vector<8x128xf32>
    %c0_32 = arith.constant 0 : index
    %c0_33 = arith.constant 0 : index
    %50 = vector.load %arg12[%c0_32, %c0_33] : memref<1x128xf32, #tpu.memory_space<vmem>>, vector<1x128xf32>
    %51 = vector.broadcast %50 : vector<1x128xf32> to vector<8x128xf32>
    %52 = arith.addf %49, %51 : vector<8x128xf32>
    %cst_34 = arith.constant 0.000000e+00 : f32
    %53 = vector.broadcast %cst_34 : f32 to vector<8x128xf32>
    %54 = arith.cmpf ogt, %52, %53 : vector<8x128xf32>
    %cst_35 = arith.constant 0.00999999977 : f32
    %55 = vector.broadcast %cst_35 : f32 to vector<8x128xf32>
    %56 = arith.mulf %55, %52 : vector<8x128xf32>
    %57 = arith.select %54, %52, %56 : vector<8x128xi1>, vector<8x128xf32>
    %c0_36 = arith.constant 0 : index
    %c0_37 = arith.constant 0 : index
    %58 = vector.load %arg13[%c0_36, %c0_37] : memref<1x128xf32, #tpu.memory_space<vmem>>, vector<1x128xf32>
    %59 = vector.broadcast %58 : vector<1x128xf32> to vector<8x128xf32>
    %60 = arith.mulf %57, %59 : vector<8x128xf32>
    %cst_38 = arith.constant dense<0.000000e+00> : vector<8xf32>
    %61 = vector.multi_reduction <add>, %60, %cst_38 [1] : vector<8x128xf32> to vector<8xf32>
    %62 = vector.shape_cast %61 : vector<8xf32> to vector<8x1xf32>
    %c0_39 = arith.constant 0 : index
    %c0_40 = arith.constant 0 : index
    %63 = memref.load %arg14[%c0_39, %c0_40] : memref<1x1xf32, #tpu.memory_space<smem>>
    %64 = vector.broadcast %63 : f32 to vector<8x1xf32>
    %65 = arith.addf %62, %64 : vector<8x1xf32>
    %c0_41 = arith.constant 0 : index
    %c0_42 = arith.constant 0 : index
    %66 = vector.load %arg15[%c0_41, %c0_42] : memref<8x4xf32, #tpu.memory_space<vmem>>, vector<8x1xf32>
    tpu.vector_store %arg15[%c0_41, %c0_42], %65 {strides = array<i32>} : memref<8x4xf32, #tpu.memory_space<vmem>>, vector<8x1xf32>,
    return
  }
  func.func @transform_0(%arg0: i32) -> (i32, i32) {
    %c0_i32 = arith.constant 0 : i32
    %c0_i32_0 = arith.constant 0 : i32
    return %arg0, %c0_i32 : i32, i32
  }
  func.func @transform_1(%arg0: i32) -> (i32, i32) {
    %c0_i32 = arith.constant 0 : i32
    %c0_i32_0 = arith.constant 0 : i32
    %c0_i32_1 = arith.constant 0 : i32
    return %c0_i32, %c0_i32_0 : i32, i32
  }
  func.func @transform_2(%arg0: i32) -> (i32, i32) {
    %c0_i32 = arith.constant 0 : i32
    %c0_i32_0 = arith.constant 0 : i32
    %c0_i32_1 = arith.constant 0 : i32
    return %c0_i32, %c0_i32_0 : i32, i32
  }
  func.func @transform_3(%arg0: i32) -> (i32, i32) {
    %c0_i32 = arith.constant 0 : i32
    %c0_i32_0 = arith.constant 0 : i32
    %c0_i32_1 = arith.constant 0 : i32
    return %c0_i32, %c0_i32_0 : i32, i32
  }
  func.func @transform_4(%arg0: i32) -> (i32, i32) {
    %c0_i32 = arith.constant 0 : i32
    %c0_i32_0 = arith.constant 0 : i32
    %c0_i32_1 = arith.constant 0 : i32
    return %c0_i32, %c0_i32_0 : i32, i32
  }
  func.func @transform_5(%arg0: i32) -> (i32, i32) {
    %c0_i32 = arith.constant 0 : i32
    %c0_i32_0 = arith.constant 0 : i32
    %c0_i32_1 = arith.constant 0 : i32
    return %c0_i32, %c0_i32_0 : i32, i32
  }
  func.func @transform_6(%arg0: i32) -> (i32, i32) {
    %c0_i32 = arith.constant 0 : i32
    %c0_i32_0 = arith.constant 0 : i32
    %c0_i32_1 = arith.constant 0 : i32
    return %c0_i32, %c0_i32_0 : i32, i32
  }
  func.func @transform_7(%arg0: i32) -> (i32, i32) {
    %c0_i32 = arith.constant 0 : i32
    %c0_i32_0 = arith.constant 0 : i32
    %c0_i32_1 = arith.constant 0 : i32
    return %c0_i32, %c0_i32_0 : i32, i32
  }
  func.func @transform_8(%arg0: i32) -> (i32, i32) {
    %c0_i32 = arith.constant 0 : i32
    %c0_i32_0 = arith.constant 0 : i32
    %c0_i32_1 = arith.constant 0 : i32
    return %c0_i32, %c0_i32_0 : i32, i32
  }
  func.func @transform_9(%arg0: i32) -> (i32, i32) {
    %c0_i32 = arith.constant 0 : i32
    %c0_i32_0 = arith.constant 0 : i32
    %c0_i32_1 = arith.constant 0 : i32
    return %c0_i32, %c0_i32_0 : i32, i32
  }
  func.func @transform_10(%arg0: i32) -> (i32, i32) {
    %c0_i32 = arith.constant 0 : i32
    %c0_i32_0 = arith.constant 0 : i32
    %c0_i32_1 = arith.constant 0 : i32
    return %c0_i32, %c0_i32_0 : i32, i32
  }
  func.func @transform_11(%arg0: i32) -> (i32, i32) {
    %c0_i32 = arith.constant 0 : i32
    %c0_i32_0 = arith.constant 0 : i32
    %c0_i32_1 = arith.constant 0 : i32
    return %c0_i32, %c0_i32_0 : i32, i32
  }
  func.func @transform_12(%arg0: i32) -> (i32, i32) {
    %c0_i32 = arith.constant 0 : i32
    %c0_i32_0 = arith.constant 0 : i32
    %c0_i32_1 = arith.constant 0 : i32
    return %c0_i32, %c0_i32_0 : i32, i32
  }
  func.func @transform_13(%arg0: i32) -> (i32, i32) {
    %c0_i32 = arith.constant 0 : i32
    %c0_i32_0 = arith.constant 0 : i32
    %c0_i32_1 = arith.constant 0 : i32
    return %c0_i32, %c0_i32_0 : i32, i32
  }
  func.func @transform_14(%arg0: i32) -> (i32, i32) {
    %c0_i32 = arith.constant 0 : i32
    %c0_i32_0 = arith.constant 0 : i32
    return %arg0, %c0_i32 : i32, i32
  }
}

</mosaic_0001>

<bundles_post_ra>
// kernel: _run.1
= control target key start
LH: loop header
LB: loop body
LE: loop exit
PB: predicated region body
PF: predicated region fallthrough
CT: control target
= control target key end

     0   :  { %23 = vsyncpa [#allocation7], 0  ;;  %s971_s0 = inlined_call_operand.vmem [shape: bf16[8,256], index: 0, kind: input, shape index: {}]   ;;  %s972_s1 = inlined_call_operand.vmem [shape: f32[1,256], index: 1, kind: input, shape index: {}]   ;;  %s973_s2 = inlined_call_operand.vmem [shape: f32[1,128], index: 2, kind: input, shape index: {}]   ;;  %s974_s3 = inlined_call_operand.<no memory space> [shape: f32[1,1], index: 3, kind: input, shape index: {}]   ;;  %s975_s4 = inlined_call_operand.vmem [shape: bf16[128,128], index: 4, kind: input, shape index: {}]   ;;  %s976_s5 = inlined_call_operand.hbm [shape: f32[1,128], index: 5, kind: input, shape index: {}]   ;;  %s977_s6 = inlined_call_operand.<no memory space> [shape: f32[1,1], index: 6, kind: input, shape index: {}]   ;;  %s978_s7 = inlined_call_operand.vmem [shape: bf16[128,128], index: 7, kind: input, shape index: {}]   ;;  %s979_s8 = inlined_call_operand.hbm [shape: f32[1,128], index: 8, kind: input, shape index: {}]   ;;  %s980_s9 = inlined_call_operand.<no memory space> [shape: f32[1,1], index: 9, kind: input, shape index: {}]   ;;  %s981_s10 = inlined_call_operand.hbm [shape: bf16[128,128], index: 10, kind: input, shape index: {}]   ;;  %s982_s11 = inlined_call_operand.vmem [shape: f32[1,128], index: 11, kind: input, shape index: {}]   ;;  %s983_s12 = inlined_call_operand.vmem [shape: f32[1,128], index: 12, kind: input, shape index: {}]   ;;  %s984_s13 = inlined_call_operand.<no memory space> [shape: f32[1,1], index: 13, kind: input, shape index: {}]   ;;  %s985_s14 = inlined_call_operand.vmem [shape: f32[8,4], index: 14, kind: output, shape index: {}]  }
   0x1   :  { %24 = vsyncpa [#allocation9], 0  ;;  %s733_s29 = smov [#allocation8]   ;;  %s734_s15 = smov [#allocation6]  }
   0x2   :  { %s55_s30 = sshll.u32 %s733_s29, 4  ;;  %s41_s16 = sshll.u32 %s734_s15, 4  ;;  %s56_s30 = int_to_ptr.vmem [resolvable:$true] %s55_s30  ;;  %s42_s16 = int_to_ptr.vmem [resolvable:$true] %s41_s16 }
   0x3   :  { %s663_s19 = scalar_lea.hbm %s979_s8, 16 }
   0x4   :  { %p664_p0 = scmp.ne.s32.totalorder %s979_s8, %s663_s19  ;;  %p667_p1 = scmp.lt.u32.totalorder %s663_s19, %s979_s8 }
   0x6   :  { %p669_p2 = pnand %p667_p1, %p664_p0 }
   0x8   :  { %672 = shalt.err (!%p669_p2)
}
   0x9   :  { %s673_s24 = scalar_lea.vmem %s56_s30, 16  ;;  %s677_s25 = scalar_lea.vmem %s56_s30, 32 }
   0xa   :  { %p674_p3 = scmp.ne.s32.totalorder %s56_s30, %s673_s24  ;;  %p678_p4 = scmp.lt.s32.totalorder %s56_s30, %s56_s30 }
   0xb   :  { %p679_p5 = scmp.lt.s32.totalorder %s677_s25, %s673_s24 }
   0xd   :  { %p680_p6 = por %p679_p5, %p678_p4 }
   0xf   :  { %p681_p7 = pnand %p680_p6, %p674_p3 }
  0x11   :  { %684 = shalt.err (!%p681_p7)
}
  0x12   :  { %58 = dma.hbm_to_vmem [thread:$0]  %s979_s8, 16, %s56_s30, [#allocation9]  }
  0x13   :  { %s685_s15 = scalar_lea.hbm %s976_s5, 16 }
  0x14   :  { %p686_p8 = scmp.ne.s32.totalorder %s976_s5, %s685_s15  ;;  %p689_p9 = scmp.lt.u32.totalorder %s685_s15, %s976_s5 }
  0x16   :  { %p691_p10 = pnand %p689_p9, %p686_p8 }
  0x18   :  { %694 = shalt.err (!%p691_p10)
}
  0x19   :  { %s695_s21 = scalar_lea.vmem %s42_s16, 16  ;;  %s699_s22 = scalar_lea.vmem %s42_s16, 32 }
  0x1a   :  { %p696_p11 = scmp.ne.s32.totalorder %s42_s16, %s695_s21  ;;  %p700_p12 = scmp.lt.s32.totalorder %s42_s16, %s42_s16 }
  0x1b   :  { %p701_p13 = scmp.lt.s32.totalorder %s699_s22, %s695_s21 }
  0x1d   :  { %p702_p0 = por %p701_p13, %p700_p12 }
  0x1f   :  { %p703_p1 = pnand %p702_p0, %p696_p11 }
  0x21   :  { %706 = shalt.err (!%p703_p1)
}
  0x22   :  { %44 = dma.hbm_to_vmem [thread:$0]  %s976_s5, 16, %s42_s16, [#allocation7]  }
  0x23   :  { %s735_s23 = smov [#allocation10]   ;;  %s707_s27 = scalar_lea.hbm %s981_s10, 1024 }
  0x24   :  { %s66_s24 = sshll.u32 %s735_s23, 4  ;;  %p708_p2 = scmp.ne.s32.totalorder %s981_s10, %s707_s27  ;;  %s67_s24 = int_to_ptr.vmem [resolvable:$true] %s66_s24 }
  0x25   :  { %p711_p3 = scmp.lt.u32.totalorder %s707_s27, %s981_s10 }
  0x27   :  { %p713_p4 = pnand %p711_p3, %p708_p2 }
  0x29   :  { %716 = shalt.err (!%p713_p4)
}
  0x2a   :  { %s717_s18 = scalar_lea.vmem %s67_s24, 1024  ;;  %p722_p6 = scmp.lt.s32.totalorder %s67_s24, %s67_s24 }
  0x2b   :  { %p718_p5 = scmp.ne.s32.totalorder %s67_s24, %s717_s18  ;;  %p723_p7 = scmp.lt.s32.totalorder %s717_s18, %s717_s18 }
  0x2d   :  { %p724_p8 = por %p723_p7, %p722_p6 }
  0x2f   :  { %p725_p9 = pnand %p724_p8, %p718_p5 }
  0x31   :  { %728 = shalt.err (!%p725_p9)
}
  0x32   :  { %s736_s5 = smov 64   ;;  %s737_s16 = smov 4  }
  0x33   :  { %72 = dma.hbm_to_vmem [thread:$0]  %s981_s10, 1024, %s67_s24, [#allocation9], %s736_s5, %s736_s5, %s737_s16  }
  0x34   :  { %729 = dma.done.wait [#allocation7], 16  }
  0x35   :  { %730 = vsyncadd [#allocation7], 4294967280 }
  0x36   :  { %731 = dma.done.wait [#allocation9], 1040  }
  0x37   :  { %732 = vsyncadd [#allocation9], 4294966256  ;;  %v738_v0 = vmov 0.0   ;;  %vm739_vm0 = vmmov 0   ;;  %v633_v1 = vld [vmem:[%s975_s4] sm:$0xff]   ;;  %v634_v2 = vld [vmem:[%s975_s4 + $0x8] sm:$0xff]   ;;  %v122_v37 = vstv %s974_s3  ;;  %v243_v48 = vstv %s977_s6 }
  0x38   :  { %566 = vmatprep.subr.bf16.mxu0 %v738_v0  ;;  %582 = vmatprep.mubr.msk.bf16.mxu0 %vm739_vm0, %v738_v0  ;;  %v635_v3 = vld [vmem:[%s975_s4 + $0x10] sm:$0xff]   ;;  %v536_v4 = vld [vmem:[%s971_s0] sm:$0xff]   ;;  %v636_v10 = vld [vmem:[%s975_s4 + $0x18] sm:$0xff]   ;;  %vm124_vm1 = vcmask 15368   ;;  %vm245_vm2 = vcmask 23568   ;;  %v364_v59 = vstv %s980_s9  ;;  %vm366_vm3 = vcmask 31768  }
  0x39   :  { %586 = vmatprep.subr.bf16.mxu1 %v738_v0  ;;  %602 = vmatprep.mubr.msk.bf16.mxu1 %vm739_vm0, %v738_v0  ;;  %v504_v5 = vld [vmem:[%s972_s1] ss:$0 sm:$0xff]  ;;  %v505_v6 = vld [vmem:[%s972_s1 + $0x1] ss:$0 sm:$0xff]  ;;  %v537_v7 = vunpack.c.l.bf16 %v536_v4  ;;  %v538_v8 = vunpack.c.h.bf16 %v536_v4  ;;  %v642_v13 = vld [vmem:[%s978_s7 + $0x8] sm:$0xff]   ;;  %vm496_vm5 = vcmask 7168  }
  0x3a   :  { %567 = vmatpush3.bf16.msra.mxu0 %v633_v1  ;;  %v641_v9 = vld [vmem:[%s978_s7] sm:$0xff]   ;;  %v643_v16 = vld [vmem:[%s978_s7 + $0x10] sm:$0xff]   ;;  %v638_v17 = vld [vmem:[%s975_s4 + $0x28] sm:$0xff]  }
  0x3b   :  { %568 = vmatprep.subr.bf16.mxu0 %v738_v0  ;;  %v98_v11 = vmul.f32 %v537_v7, %v504_v5  ;;  %v108_v12 = vmul.f32 %v538_v8, %v505_v6  ;;  %587 = vmatpush3.bf16.msra.mxu1 %v641_v9  ;;  %v637_v14 = vld [vmem:[%s975_s4 + $0x20] sm:$0xff]   ;;  %v644_v18 = vld [vmem:[%s978_s7 + $0x18] sm:$0xff]   ;;  %v639_v19 = vld [vmem:[%s975_s4 + $0x30] sm:$0xff]   ;;  %v494_v8 = vstv %s984_s13 }
  0x3c   :  { %588 = vmatprep.subr.bf16.mxu1 %v738_v0  ;;  %v645_v20 = vld [vmem:[%s978_s7 + $0x20] sm:$0xff]   ;;  %v640_v22 = vld [vmem:[%s975_s4 + $0x38] sm:$0xff]   ;;  %v646_v24 = vld [vmem:[%s978_s7 + $0x28] sm:$0xff]  }
  0x3d   :  { %v109_v15 = vadd.f32 %v108_v12, %v98_v11  ;;  %v647_v25 = vld [vmem:[%s978_s7 + $0x30] sm:$0xff]   ;;  %v506_v26 = vld [vmem:[%s973_s2] ss:$0 sm:$0xff]  ;;  %v648_v28 = vld [vmem:[%s978_s7 + $0x38] sm:$0xff]  }
  0x3e   :  { %569 = vmatpush3.bf16.msra.mxu0 %v634_v2  ;;  %v515_v33 = vld [vmem:[#allocation6] ss:$0 sm:$0xff]  ;;  %v649_v40 = vld [vmem:[#allocation10] sm:$0xff]   ;;  %v650_v41 = vld [vmem:[#allocation10 + $0x8] sm:$0xff]  }
  0x3f   :  { %570 = vmatprep.subr.bf16.mxu0 %v738_v0  ;;  %589 = vmatpush3.bf16.msra.mxu1 %v642_v13  ;;  %657 = vtanh.f32 %v109_v15  ;;  %v651_v42 = vld [vmem:[#allocation10 + $0x10] sm:$0xff]   ;;  %v652_v43 = vld [vmem:[#allocation10 + $0x18] sm:$0xff]   ;;  %v653_v44 = vld [vmem:[#allocation10 + $0x20] sm:$0xff]  }
  0x40   :  { %590 = vmatprep.subr.bf16.mxu1 %v738_v0  ;;  %v654_v45 = vld [vmem:[#allocation10 + $0x28] sm:$0xff]   ;;  %v655_v46 = vld [vmem:[#allocation10 + $0x30] sm:$0xff]   ;;  %v656_v47 = vld [vmem:[#allocation10 + $0x38] sm:$0xff]  }
  0x41   :  { %v524_v55 = vld [vmem:[#allocation8] ss:$0 sm:$0xff]  ;;  %v525_v62 = vld [vmem:[%s982_s11] ss:$0 sm:$0xff] }
  0x42   :  { %571 = vmatpush3.bf16.msra.mxu0 %v635_v3  ;;  %v534_v5 = vld [vmem:[%s983_s12] ss:$0 sm:$0xff] }
  0x43   :  { %572 = vmatprep.subr.bf16.mxu0 %v738_v0  ;;  %591 = vmatpush3.bf16.msra.mxu1 %v643_v16 }
  0x44   :  { %592 = vmatprep.subr.bf16.mxu1 %v738_v0 }
  0x46   :  { %573 = vmatpush3.bf16.msra.mxu0 %v636_v10 }
  0x47   :  { %574 = vmatprep.subr.bf16.mxu0 %v738_v0  ;;  %593 = vmatpush3.bf16.msra.mxu1 %v644_v18 }
  0x48   :  { %594 = vmatprep.subr.bf16.mxu1 %v738_v0 }
  0x49   :  { %v658_v21 = vpop.eup %657 }
  0x4a   :  { %575 = vmatpush3.bf16.msra.mxu0 %v637_v14  ;;  %v126_v23 = vpack.c.bf16 %v658_v21, %v658_v21  ;;  %v118_v27 = vmul.f32 %v658_v21, %v506_v26 }
  0x4b   :  { %576 = vmatprep.subr.bf16.mxu0 %v738_v0  ;;  %595 = vmatpush3.bf16.msra.mxu1 %v645_v20 }
  0x4c   :  { %596 = vmatprep.subr.bf16.mxu1 %v738_v0  ;;  %119 = vadd.xlane.f32.xlu0 %v118_v27 }
  0x4e   :  { %577 = vmatpush3.bf16.msra.mxu0 %v638_v17 }
  0x4f   :  { %578 = vmatprep.subr.bf16.mxu0 %v738_v0  ;;  %597 = vmatpush3.bf16.msra.mxu1 %v646_v24 }
  0x50   :  { %598 = vmatprep.subr.bf16.mxu1 %v738_v0 }
  0x52   :  { %579 = vmatpush3.bf16.msra.mxu0 %v639_v19 }
  0x53   :  { %580 = vmatprep.subr.bf16.mxu0 %v738_v0  ;;  %599 = vmatpush3.bf16.msra.mxu1 %v647_v25 }
  0x54   :  { %600 = vmatprep.subr.bf16.mxu1 %v738_v0 }
  0x56   :  { %581 = vmatpush3.bf16.msra.mxu0 %v640_v22 }
  0x57   :  { %606 = vmatprep.subr.bf16.mxu0 %v738_v0  ;;  %601 = vmatpush3.bf16.msra.mxu1 %v648_v28 }
  0x59   :  { %583 = vmatmul.mubr.bf16.vlgmr.msra.gmra.mrb[0].mxu0 %v126_v23 }
  0x5a   :  { %622 = vmatprep.mubr.msk.bf16.mxu0 %vm739_vm0, %v738_v0  ;;  %607 = vmatpush3.bf16.msra.mxu0 %v649_v40 }
  0x5b   :  { %608 = vmatprep.subr.bf16.mxu0 %v738_v0 }
  0x5e   :  { %609 = vmatpush3.bf16.msra.mxu0 %v650_v41 }
  0x5f   :  { %610 = vmatprep.subr.bf16.mxu0 %v738_v0 }
  0x62   :  { %611 = vmatpush3.bf16.msra.mxu0 %v651_v42 }
  0x63   :  { %612 = vmatprep.subr.bf16.mxu0 %v738_v0 }
  0x66   :  { %613 = vmatpush3.bf16.msra.mxu0 %v652_v43 }
  0x67   :  { %614 = vmatprep.subr.bf16.mxu0 %v738_v0 }
  0x6a   :  { %615 = vmatpush3.bf16.msra.mxu0 %v653_v44 }
  0x6b   :  { %616 = vmatprep.subr.bf16.mxu0 %v738_v0 }
  0x6e   :  { %617 = vmatpush3.bf16.msra.mxu0 %v654_v45 }
  0x6f   :  { %618 = vmatprep.subr.bf16.mxu0 %v738_v0 }
  0x72   :  { %619 = vmatpush3.bf16.msra.mxu0 %v655_v46 }
  0x73   :  { %620 = vmatprep.subr.bf16.mxu0 %v738_v0 }
  0x76   :  { %621 = vmatpush3.bf16.msra.mxu0 %v656_v47 }
  0xd9   :  { %v120_v38 = vpop.xlane.xlu0 %119 }
  0xda   :  { %v123_v39 = vadd.f32 %v122_v37, %v120_v38 }
  0xdc   :  { %125 = vst.msk [vmem:[%s985_s14] sm:$0xff] %vm124_vm1, %v123_v39 }
 0x12c   :  { %v225_v29 = vpop.f32.mrb[0].mxu0 }
 0x12d   :  { %659 = vtanh.f32 %v225_v29  ;;  %v584_v30 = vpop.f32.mrb[1].mxu0 }
 0x12e   :  { %v228_v31 = vpop.f32.mrb[2].mxu0 }
 0x12f   :  { %v585_v32 = vpop.f32.mrb[3].mxu0 }
 0x137   :  { %v660_v34 = vpop.eup %659 }
 0x138   :  { %v247_v35 = vpack.c.bf16 %v660_v34, %v660_v34  ;;  %v239_v36 = vmul.f32 %v660_v34, %v515_v33 }
 0x13a   :  { %603 = vmatmul.mubr.bf16.vlgmr.msra.gmra.mrb[0].mxu1 %v247_v35  ;;  %240 = vadd.xlane.f32.xlu0 %v239_v36 }
 0x1c7   :  { %v241_v49 = vpop.xlane.xlu0 %240 }
 0x1c8   :  { %v244_v50 = vadd.f32 %v243_v48, %v241_v49 }
 0x1ca   :  { %246 = vst.msk [vmem:[%s985_s14] sm:$0xff] %vm245_vm2, %v244_v50 }
 0x20d   :  { %v346_v51 = vpop.f32.mrb[0].mxu1 }
 0x20e   :  { %661 = vtanh.f32 %v346_v51  ;;  %v604_v52 = vpop.f32.mrb[1].mxu1 }
 0x20f   :  { %v349_v53 = vpop.f32.mrb[2].mxu1 }
 0x210   :  { %v605_v54 = vpop.f32.mrb[3].mxu1 }
 0x218   :  { %v662_v56 = vpop.eup %661 }
 0x219   :  { %v368_v57 = vpack.c.bf16 %v662_v56, %v662_v56  ;;  %v360_v58 = vmul.f32 %v662_v56, %v524_v55 }
 0x21b   :  { %623 = vmatmul.mubr.bf16.vlgmr.msra.gmra.mrb[4].mxu0 %v368_v57  ;;  %361 = vadd.xlane.f32.xlu1 %v360_v58 }
 0x2a8   :  { %v362_v60 = vpop.xlane.xlu1 %361 }
 0x2a9   :  { %v365_v61 = vadd.f32 %v364_v59, %v362_v60 }
 0x2ab   :  { %367 = vst.msk [vmem:[%s985_s14] sm:$0xff] %vm366_vm3, %v365_v61 }
 0x2ee   :  { %v474_v63 = vpop.f32.mrb[4].mxu0 }
 0x2ef   :  { %v475_v0 = vadd.f32 %v525_v62, %v474_v63  ;;  %v624_v1 = vpop.f32.mrb[5].mxu0 }
 0x2f0   :  { %v477_v2 = vpop.f32.mrb[6].mxu0 }
 0x2f1   :  { %v481_v3 = vmul.f32 0.01, %v475_v0  ;;  %v625_v4 = vpop.f32.mrb[7].mxu0  ;;  %vm480_vm4 = vcmp.gt.f32.partialorder %v475_v0, 0.0 }
 0x2f3   :  { %v482_v6 = vsel %vm480_vm4, %v475_v0, %v481_v3 }
 0x2f4   :  { %v490_v7 = vmul.f32 %v534_v5, %v482_v6 }
 0x2f6   :  { %491 = vadd.xlane.f32.xlu1 %v490_v7 }
 0x383   :  { %v492_v9 = vpop.xlane.xlu1 %491 }
 0x384   :  { %v495_v10 = vadd.f32 %v494_v8, %v492_v9 }
 0x386   :  { %497 = vst.msk [vmem:[%s985_s14] sm:$0xff] %vm496_vm5, %v495_v10 }
 0x387   :  { %502 = vsyncpa [#allocation7], 1 }
 0x388   :  { %503 = vsyncpa [#allocation9], 1 }

// kernel: _run.1
= control target key start
LH: loop header
LB: loop body
LE: loop exit
PB: predicated region body
PF: predicated region fallthrough
CT: control target
= control target key end

     0   :  { %23 = vsyncpa [#allocation7], 0  ;;  %s971_s0 = inlined_call_operand.vmem [shape: bf16[8,256], index: 0, kind: input, shape index: {}]   ;;  %s972_s1 = inlined_call_operand.vmem [shape: f32[1,256], index: 1, kind: input, shape index: {}]   ;;  %s973_s2 = inlined_call_operand.vmem [shape: f32[1,128], index: 2, kind: input, shape index: {}]   ;;  %s974_s3 = inlined_call_operand.<no memory space> [shape: f32[1,1], index: 3, kind: input, shape index: {}]   ;;  %s975_s4 = inlined_call_operand.vmem [shape: bf16[128,128], index: 4, kind: input, shape index: {}]   ;;  %s976_s5 = inlined_call_operand.hbm [shape: f32[1,128], index: 5, kind: input, shape index: {}]   ;;  %s977_s6 = inlined_call_operand.<no memory space> [shape: f32[1,1], index: 6, kind: input, shape index: {}]   ;;  %s978_s7 = inlined_call_operand.vmem [shape: bf16[128,128], index: 7, kind: input, shape index: {}]   ;;  %s979_s8 = inlined_call_operand.hbm [shape: f32[1,128], index: 8, kind: input, shape index: {}]   ;;  %s980_s9 = inlined_call_operand.<no memory space> [shape: f32[1,1], index: 9, kind: input, shape index: {}]   ;;  %s981_s10 = inlined_call_operand.hbm [shape: bf16[128,128], index: 10, kind: input, shape index: {}]   ;;  %s982_s11 = inlined_call_operand.vmem [shape: f32[1,128], index: 11, kind: input, shape index: {}]   ;;  %s983_s12 = inlined_call_operand.vmem [shape: f32[1,128], index: 12, kind: input, shape index: {}]   ;;  %s984_s13 = inlined_call_operand.<no memory space> [shape: f32[1,1], index: 13, kind: input, shape index: {}]   ;;  %s985_s14 = inlined_call_operand.vmem [shape: f32[8,4], index: 14, kind: output, shape index: {}]  }
   0x1   :  { %24 = vsyncpa [#allocation9], 0  ;;  %s733_s29 = smov [#allocation8]   ;;  %s734_s15 = smov [#allocation6]  }
   0x2   :  { %s55_s30 = sshll.u32 %s733_s29, 4  ;;  %s41_s16 = sshll.u32 %s734_s15, 4  ;;  %s56_s30 = int_to_ptr.vmem [resolvable:$true] %s55_s30  ;;  %s42_s16 = int_to_ptr.vmem [resolvable:$true] %s41_s16 }
   0x3   :  { %s663_s19 = scalar_lea.hbm %s979_s8, 16 }
   0x4   :  { %p664_p0 = scmp.ne.s32.totalorder %s979_s8, %s663_s19  ;;  %p667_p1 = scmp.lt.u32.totalorder %s663_s19, %s979_s8 }
   0x6   :  { %p669_p2 = pnand %p667_p1, %p664_p0 }
   0x8   :  { %672 = shalt.err (!%p669_p2)
}
   0x9   :  { %s673_s24 = scalar_lea.vmem %s56_s30, 16  ;;  %s677_s25 = scalar_lea.vmem %s56_s30, 32 }
   0xa   :  { %p674_p3 = scmp.ne.s32.totalorder %s56_s30, %s673_s24  ;;  %p678_p4 = scmp.lt.s32.totalorder %s56_s30, %s56_s30 }
   0xb   :  { %p679_p5 = scmp.lt.s32.totalorder %s677_s25, %s673_s24 }
   0xd   :  { %p680_p6 = por %p679_p5, %p678_p4 }
   0xf   :  { %p681_p7 = pnand %p680_p6, %p674_p3 }
  0x11   :  { %684 = shalt.err (!%p681_p7)
}
  0x12   :  { %58 = dma.hbm_to_vmem [thread:$0]  %s979_s8, 16, %s56_s30, [#allocation9]  }
  0x13   :  { %s685_s15 = scalar_lea.hbm %s976_s5, 16 }
  0x14   :  { %p686_p8 = scmp.ne.s32.totalorder %s976_s5, %s685_s15  ;;  %p689_p9 = scmp.lt.u32.totalorder %s685_s15, %s976_s5 }
  0x16   :  { %p691_p10 = pnand %p689_p9, %p686_p8 }
  0x18   :  { %694 = shalt.err (!%p691_p10)
}
  0x19   :  { %s695_s21 = scalar_lea.vmem %s42_s16, 16  ;;  %s699_s22 = scalar_lea.vmem %s42_s16, 32 }
  0x1a   :  { %p696_p11 = scmp.ne.s32.totalorder %s42_s16, %s695_s21  ;;  %p700_p12 = scmp.lt.s32.totalorder %s42_s16, %s42_s16 }
  0x1b   :  { %p701_p13 = scmp.lt.s32.totalorder %s699_s22, %s695_s21 }
  0x1d   :  { %p702_p0 = por %p701_p13, %p700_p12 }
  0x1f   :  { %p703_p1 = pnand %p702_p0, %p696_p11 }
  0x21   :  { %706 = shalt.err (!%p703_p1)
}
  0x22   :  { %44 = dma.hbm_to_vmem [thread:$0]  %s976_s5, 16, %s42_s16, [#allocation7]  }
  0x23   :  { %s735_s23 = smov [#allocation10]   ;;  %s707_s27 = scalar_lea.hbm %s981_s10, 1024 }
  0x24   :  { %s66_s24 = sshll.u32 %s735_s23, 4  ;;  %p708_p2 = scmp.ne.s32.totalorder %s981_s10, %s707_s27  ;;  %s67_s24 = int_to_ptr.vmem [resolvable:$true] %s66_s24 }
  0x25   :  { %p711_p3 = scmp.lt.u32.totalorder %s707_s27, %s981_s10 }
  0x27   :  { %p713_p4 = pnand %p711_p3, %p708_p2 }
  0x29   :  { %716 = shalt.err (!%p713_p4)
}
  0x2a   :  { %s717_s18 = scalar_lea.vmem %s67_s24, 1024  ;;  %p722_p6 = scmp.lt.s32.totalorder %s67_s24, %s67_s24 }
  0x2b   :  { %p718_p5 = scmp.ne.s32.totalorder %s67_s24, %s717_s18  ;;  %p723_p7 = scmp.lt.s32.totalorder %s717_s18, %s717_s18 }
  0x2d   :  { %p724_p8 = por %p723_p7, %p722_p6 }
  0x2f   :  { %p725_p9 = pnand %p724_p8, %p718_p5 }
  0x31   :  { %728 = shalt.err (!%p725_p9)
}
  0x32   :  { %s736_s5 = smov 64   ;;  %s737_s16 = smov 4  }
  0x33   :  { %72 = dma.hbm_to_vmem [thread:$0]  %s981_s10, 1024, %s67_s24, [#allocation9], %s736_s5, %s736_s5, %s737_s16  }
  0x34   :  { %729 = dma.done.wait [#allocation7], 16  }
  0x35   :  { %730 = vsyncadd [#allocation7], 4294967280 }
  0x36   :  { %731 = dma.done.wait [#allocation9], 1040  }
  0x37   :  { %732 = vsyncadd [#allocation9], 4294966256  ;;  %v738_v0 = vmov 0.0   ;;  %vm739_vm0 = vmmov 0   ;;  %v633_v1 = vld [vmem:[%s975_s4] sm:$0xff]   ;;  %v634_v2 = vld [vmem:[%s975_s4 + $0x8] sm:$0xff]   ;;  %v122_v37 = vstv %s974_s3  ;;  %v243_v48 = vstv %s977_s6 }
  0x38   :  { %566 = vmatprep.subr.bf16.mxu0 %v738_v0  ;;  %582 = vmatprep.mubr.msk.bf16.mxu0 %vm739_vm0, %v738_v0  ;;  %v635_v3 = vld [vmem:[%s975_s4 + $0x10] sm:$0xff]   ;;  %v536_v4 = vld [vmem:[%s971_s0] sm:$0xff]   ;;  %v636_v10 = vld [vmem:[%s975_s4 + $0x18] sm:$0xff]   ;;  %vm124_vm1 = vcmask 15368   ;;  %vm245_vm2 = vcmask 23568   ;;  %v364_v59 = vstv %s980_s9  ;;  %vm366_vm3 = vcmask 31768  }
  0x39   :  { %586 = vmatprep.subr.bf16.mxu1 %v738_v0  ;;  %602 = vmatprep.mubr.msk.bf16.mxu1 %vm739_vm0, %v738_v0  ;;  %v504_v5 = vld [vmem:[%s972_s1] ss:$0 sm:$0xff]  ;;  %v505_v6 = vld [vmem:[%s972_s1 + $0x1] ss:$0 sm:$0xff]  ;;  %v537_v7 = vunpack.c.l.bf16 %v536_v4  ;;  %v538_v8 = vunpack.c.h.bf16 %v536_v4  ;;  %v642_v13 = vld [vmem:[%s978_s7 + $0x8] sm:$0xff]   ;;  %vm496_vm5 = vcmask 7168  }
  0x3a   :  { %567 = vmatpush3.bf16.msra.mxu0 %v633_v1  ;;  %v641_v9 = vld [vmem:[%s978_s7] sm:$0xff]   ;;  %v643_v16 = vld [vmem:[%s978_s7 + $0x10] sm:$0xff]   ;;  %v638_v17 = vld [vmem:[%s975_s4 + $0x28] sm:$0xff]  }
  0x3b   :  { %568 = vmatprep.subr.bf16.mxu0 %v738_v0  ;;  %v98_v11 = vmul.f32 %v537_v7, %v504_v5  ;;  %v108_v12 = vmul.f32 %v538_v8, %v505_v6  ;;  %587 = vmatpush3.bf16.msra.mxu1 %v641_v9  ;;  %v637_v14 = vld [vmem:[%s975_s4 + $0x20] sm:$0xff]   ;;  %v644_v18 = vld [vmem:[%s978_s7 + $0x18] sm:$0xff]   ;;  %v639_v19 = vld [vmem:[%s975_s4 + $0x30] sm:$0xff]   ;;  %v494_v8 = vstv %s984_s13 }
  0x3c   :  { %588 = vmatprep.subr.bf16.mxu1 %v738_v0  ;;  %v645_v20 = vld [vmem:[%s978_s7 + $0x20] sm:$0xff]   ;;  %v640_v22 = vld [vmem:[%s975_s4 + $0x38] sm:$0xff]   ;;  %v646_v24 = vld [vmem:[%s978_s7 + $0x28] sm:$0xff]  }
  0x3d   :  { %v109_v15 = vadd.f32 %v108_v12, %v98_v11  ;;  %v647_v25 = vld [vmem:[%s978_s7 + $0x30] sm:$0xff]   ;;  %v506_v26 = vld [vmem:[%s973_s2] ss:$0 sm:$0xff]  ;;  %v648_v28 = vld [vmem:[%s978_s7 + $0x38] sm:$0xff]  }
  0x3e   :  { %569 = vmatpush3.bf16.msra.mxu0 %v634_v2  ;;  %v515_v33 = vld [vmem:[#allocation6] ss:$0 sm:$0xff]  ;;  %v649_v40 = vld [vmem:[#allocation10] sm:$0xff]   ;;  %v650_v41 = vld [vmem:[#allocation10 + $0x8] sm:$0xff]  }
  0x3f   :  { %570 = vmatprep.subr.bf16.mxu0 %v738_v0  ;;  %589 = vmatpush3.bf16.msra.mxu1 %v642_v13  ;;  %657 = vtanh.f32 %v109_v15  ;;  %v651_v42 = vld [vmem:[#allocation10 + $0x10] sm:$0xff]   ;;  %v652_v43 = vld [vmem:[#allocation10 + $0x18] sm:$0xff]   ;;  %v653_v44 = vld [vmem:[#allocation10 + $0x20] sm:$0xff]  }
  0x40   :  { %590 = vmatprep.subr.bf16.mxu1 %v738_v0  ;;  %v654_v45 = vld [vmem:[#allocation10 + $0x28] sm:$0xff]   ;;  %v655_v46 = vld [vmem:[#allocation10 + $0x30] sm:$0xff]   ;;  %v656_v47 = vld [vmem:[#allocation10 + $0x38] sm:$0xff]  }
  0x41   :  { %v524_v55 = vld [vmem:[#allocation8] ss:$0 sm:$0xff]  ;;  %v525_v62 = vld [vmem:[%s982_s11] ss:$0 sm:$0xff] }
  0x42   :  { %571 = vmatpush3.bf16.msra.mxu0 %v635_v3  ;;  %v534_v5 = vld [vmem:[%s983_s12] ss:$0 sm:$0xff] }
  0x43   :  { %572 = vmatprep.subr.bf16.mxu0 %v738_v0  ;;  %591 = vmatpush3.bf16.msra.mxu1 %v643_v16 }
  0x44   :  { %592 = vmatprep.subr.bf16.mxu1 %v738_v0 }
  0x46   :  { %573 = vmatpush3.bf16.msra.mxu0 %v636_v10 }
  0x47   :  { %574 = vmatprep.subr.bf16.mxu0 %v738_v0  ;;  %593 = vmatpush3.bf16.msra.mxu1 %v644_v18 }
  0x48   :  { %594 = vmatprep.subr.bf16.mxu1 %v738_v0 }
  0x49   :  { %v658_v21 = vpop.eup %657 }
  0x4a   :  { %575 = vmatpush3.bf16.msra.mxu0 %v637_v14  ;;  %v126_v23 = vpack.c.bf16 %v658_v21, %v658_v21  ;;  %v118_v27 = vmul.f32 %v658_v21, %v506_v26 }
  0x4b   :  { %576 = vmatprep.subr.bf16.mxu0 %v738_v0  ;;  %595 = vmatpush3.bf16.msra.mxu1 %v645_v20 }
  0x4c   :  { %596 = vmatprep.subr.bf16.mxu1 %v738_v0  ;;  %119 = vadd.xlane.f32.xlu0 %v118_v27 }
  0x4e   :  { %577 = vmatpush3.bf16.msra.mxu0 %v638_v17 }
  0x4f   :  { %578 = vmatprep.subr.bf16.mxu0 %v738_v0  ;;  %597 = vmatpush3.bf16.msra.mxu1 %v646_v24 }
  0x50   :  { %598 = vmatprep.subr.bf16.mxu1 %v738_v0 }
  0x52   :  { %579 = vmatpush3.bf16.msra.mxu0 %v639_v19 }
  0x53   :  { %580 = vmatprep.subr.bf16.mxu0 %v738_v0  ;;  %599 = vmatpush3.bf16.msra.mxu1 %v647_v25 }
  0x54   :  { %600 = vmatprep.subr.bf16.mxu1 %v738_v0 }
  0x56   :  { %581 = vmatpush3.bf16.msra.mxu0 %v640_v22 }
  0x57   :  { %606 = vmatprep.subr.bf16.mxu0 %v738_v0  ;;  %601 = vmatpush3.bf16.msra.mxu1 %v648_v28 }
  0x59   :  { %583 = vmatmul.mubr.bf16.vlgmr.msra.gmra.mrb[0].mxu0 %v126_v23 }
  0x5a   :  { %622 = vmatprep.mubr.msk.bf16.mxu0 %vm739_vm0, %v738_v0  ;;  %607 = vmatpush3.bf16.msra.mxu0 %v649_v40 }
  0x5b   :  { %608 = vmatprep.subr.bf16.mxu0 %v738_v0 }
  0x5e   :  { %609 = vmatpush3.bf16.msra.mxu0 %v650_v41 }
  0x5f   :  { %610 = vmatprep.subr.bf16.mxu0 %v738_v0 }
  0x62   :  { %611 = vmatpush3.bf16.msra.mxu0 %v651_v42 }
  0x63   :  { %612 = vmatprep.subr.bf16.mxu0 %v738_v0 }
  0x66   :  { %613 = vmatpush3.bf16.msra.mxu0 %v652_v43 }
  0x67   :  { %614 = vmatprep.subr.bf16.mxu0 %v738_v0 }
  0x6a   :  { %615 = vmatpush3.bf16.msra.mxu0 %v653_v44 }
  0x6b   :  { %616 = vmatprep.subr.bf16.mxu0 %v738_v0 }
  0x6e   :  { %617 = vmatpush3.bf16.msra.mxu0 %v654_v45 }
  0x6f   :  { %618 = vmatprep.subr.bf16.mxu0 %v738_v0 }
  0x72   :  { %619 = vmatpush3.bf16.msra.mxu0 %v655_v46 }
  0x73   :  { %620 = vmatprep.subr.bf16.mxu0 %v738_v0 }
  0x76   :  { %621 = vmatpush3.bf16.msra.mxu0 %v656_v47 }
  0xd9   :  { %v120_v38 = vpop.xlane.xlu0 %119 }
  0xda   :  { %v123_v39 = vadd.f32 %v122_v37, %v120_v38 }
  0xdc   :  { %125 = vst.msk [vmem:[%s985_s14] sm:$0xff] %vm124_vm1, %v123_v39 }
 0x12c   :  { %v225_v29 = vpop.f32.mrb[0].mxu0 }
 0x12d   :  { %659 = vtanh.f32 %v225_v29  ;;  %v584_v30 = vpop.f32.mrb[1].mxu0 }
 0x12e   :  { %v228_v31 = vpop.f32.mrb[2].mxu0 }
 0x12f   :  { %v585_v32 = vpop.f32.mrb[3].mxu0 }
 0x137   :  { %v660_v34 = vpop.eup %659 }
 0x138   :  { %v247_v35 = vpack.c.bf16 %v660_v34, %v660_v34  ;;  %v239_v36 = vmul.f32 %v660_v34, %v515_v33 }
 0x13a   :  { %603 = vmatmul.mubr.bf16.vlgmr.msra.gmra.mrb[0].mxu1 %v247_v35  ;;  %240 = vadd.xlane.f32.xlu0 %v239_v36 }
 0x1c7   :  { %v241_v49 = vpop.xlane.xlu0 %240 }
 0x1c8   :  { %v244_v50 = vadd.f32 %v243_v48, %v241_v49 }
 0x1ca   :  { %246 = vst.msk [vmem:[%s985_s14] sm:$0xff] %vm245_vm2, %v244_v50 }
 0x20d   :  { %v346_v51 = vpop.f32.mrb[0].mxu1 }
 0x20e   :  { %661 = vtanh.f32 %v346_v51  ;;  %v604_v52 = vpop.f32.mrb[1].mxu1 }
 0x20f   :  { %v349_v53 = vpop.f32.mrb[2].mxu1 }
 0x210   :  { %v605_v54 = vpop.f32.mrb[3].mxu1 }
 0x218   :  { %v662_v56 = vpop.eup %661 }
 0x219   :  { %v368_v57 = vpack.c.bf16 %v662_v56, %v662_v56  ;;  %v360_v58 = vmul.f32 %v662_v56, %v524_v55 }
 0x21b   :  { %623 = vmatmul.mubr.bf16.vlgmr.msra.gmra.mrb[4].mxu0 %v368_v57  ;;  %361 = vadd.xlane.f32.xlu1 %v360_v58 }
 0x2a8   :  { %v362_v60 = vpop.xlane.xlu1 %361 }
 0x2a9   :  { %v365_v61 = vadd.f32 %v364_v59, %v362_v60 }
 0x2ab   :  { %367 = vst.msk [vmem:[%s985_s14] sm:$0xff] %vm366_vm3, %v365_v61 }
 0x2ee   :  { %v474_v63 = vpop.f32.mrb[4].mxu0 }
 0x2ef   :  { %v475_v0 = vadd.f32 %v525_v62, %v474_v63  ;;  %v624_v1 = vpop.f32.mrb[5].mxu0 }
 0x2f0   :  { %v477_v2 = vpop.f32.mrb[6].mxu0 }
 0x2f1   :  { %v481_v3 = vmul.f32 0.01, %v475_v0  ;;  %v625_v4 = vpop.f32.mrb[7].mxu0  ;;  %vm480_vm4 = vcmp.gt.f32.partialorder %v475_v0, 0.0 }
 0x2f3   :  { %v482_v6 = vsel %vm480_vm4, %v475_v0, %v481_v3 }
 0x2f4   :  { %v490_v7 = vmul.f32 %v534_v5, %v482_v6 }
 0x2f6   :  { %491 = vadd.xlane.f32.xlu1 %v490_v7 }
 0x383   :  { %v492_v9 = vpop.xlane.xlu1 %491 }
 0x384   :  { %v495_v10 = vadd.f32 %v494_v8, %v492_v9 }
 0x386   :  { %497 = vst.msk [vmem:[%s985_s14] sm:$0xff] %vm496_vm5, %v495_v10 }
 0x387   :  { %502 = vsyncpa [#allocation7], 1 }
 0x388   :  { %503 = vsyncpa [#allocation9], 1 }

</bundles_post_ra>
